<compile_context>
chip_gen: v7x
topology: tpu7x:2x2x1
jax: 0.10.0
libtpu: 0.0.40
codegen_flags: <defaults>
</compile_context>

<pallas_src>
import functools

import jax
import jax.numpy as jnp
from jax.experimental import pallas as pl
from jax.experimental.pallas import tpu as pltpu

PATCH = 14
EMBED = 32
IN_CH = 3
TM_MAX = 2048      # token tile (lane axis) for kernel 1


def _cdiv(a, b):
    return (a + b - 1) // b


def _round_up(x, m):
    return _cdiv(x, m) * m


@functools.lru_cache(maxsize=1)
def _vmem_capacity_bytes():
    # Trace-time hardware query; fall back to the smallest per-core VMEM (v7x).
    try:
        cap = getattr(pltpu.get_tpu_info(), "vmem_capacity_bytes", None)
        if cap:
            return int(cap)
    except Exception:
        pass
    return 64 * 1024 * 1024


# ----------------------------------------------------------------------------
# Kernel 1: fused patch-embed encoder (matmul + bias + relu) and depth head.
# Transposed layout: tokens on the lane axis.
#   pT_ref : (Kp_pad, TM)  bf16   patches^T tile
#   w1T_ref: (E, Kp_pad)   bf16
#   b1_ref : (E, 1)        f32
#   w2_ref : (E, 1)        f32
#   b2_ref : (1, 1)        f32 (SMEM scalar)
#   o_ref  : (1, TM)       f32   lane-dense depth tokens
# ----------------------------------------------------------------------------
def enc_dec_kernel(pT_ref, w1T_ref, b1_ref, w2_ref, b2_ref, o_ref):
    hT = jnp.dot(w1T_ref[...], pT_ref[...],
                 preferred_element_type=jnp.float32)           # (E, TM)
    hT = jnp.maximum(hT + b1_ref[...], 0.0)
    # Depth head as a VPU multiply + sublane reduction (no N=1 MXU matmul).
    d = jnp.sum(hT * w2_ref[...], axis=0, keepdims=True)       # (1, TM)
    o_ref[...] = d + b2_ref[0, 0]


def run_encoder_decoder(pT, w1T, b1_col, w2, b2, tm, vmem_limit):
    kp_pad, m_pad = pT.shape
    e = w1T.shape[0]
    return pl.pallas_call(
        enc_dec_kernel,
        out_shape=jax.ShapeDtypeStruct((1, m_pad), jnp.float32),
        grid=(m_pad // tm,),
        in_specs=[
            pl.BlockSpec((kp_pad, tm), lambda i: (0, i)),
            pl.BlockSpec((e, kp_pad), lambda i: (0, 0)),
            pl.BlockSpec((e, 1), lambda i: (0, 0)),
            pl.BlockSpec((e, 1), lambda i: (0, 0)),
            pl.BlockSpec(memory_space=pltpu.MemorySpace.SMEM),
        ],
        out_specs=pl.BlockSpec((1, tm), lambda i: (0, i)),
        compiler_params=pltpu.CompilerParams(
            dimension_semantics=("parallel",),
            vmem_limit_bytes=int(vmem_limit)),
    )(pT, w1T, b1_col, w2, b2)


# ----------------------------------------------------------------------------
# Kernel 2: bilinear upsample (align_corners=True) + ReLU.
# Width upsample first (lane-dense intermediate), then height upsample.
# Processes Bt images per grid step (static unroll); emits the singleton
# channel axis directly.
#   d_ref  : (Bt, ph, pw)
#   wwT_ref: (pw, Wo)
#   wh_ref : (Ho, ph)
#   o_ref  : (Bt, 1, Ho, Wo)
# ----------------------------------------------------------------------------
def upsample_relu_kernel(d_ref, wwT_ref, wh_ref, o_ref, *, bt):
    wwT = wwT_ref[...]
    wh = wh_ref[...]
    for b in range(bt):                                   # static unroll
        t = jnp.dot(d_ref[b, :, :], wwT,
                    preferred_element_type=jnp.float32)   # (ph, Wo) lane-dense
        o_ref[b, 0, :, :] = jnp.maximum(
            jnp.dot(wh, t, preferred_element_type=jnp.float32), 0.0)


def run_upsample_relu(depth_lr, wwT, wh, bt, vmem_limit):
    B, ph, pw = depth_lr.shape
    Ho = wh.shape[0]
    Wo = wwT.shape[1]
    return pl.pallas_call(
        functools.partial(upsample_relu_kernel, bt=bt),
        out_shape=jax.ShapeDtypeStruct((B, 1, Ho, Wo), jnp.float32),
        grid=(B // bt,),
        in_specs=[
            pl.BlockSpec((bt, ph, pw), lambda i: (i, 0, 0)),
            pl.BlockSpec((pw, Wo), lambda i: (0, 0)),
            pl.BlockSpec((Ho, ph), lambda i: (0, 0)),
        ],
        out_specs=pl.BlockSpec((bt, 1, Ho, Wo), lambda i: (i, 0, 0, 0)),
        compiler_params=pltpu.CompilerParams(
            dimension_semantics=("parallel",),
            vmem_limit_bytes=int(vmem_limit)),
    )(depth_lr, wwT, wh)


# ----------------------------------------------------------------------------
# Glue (plain JAX): transposed/padded patchify, align_corners interpolation
# matrices, parameter init.
# ----------------------------------------------------------------------------
def patchify_transposed(x, kp_pad, m_pad):
    # x: [B, C, H, W] -> patches^T: [kp_pad, m_pad] (zero padded), bf16.
    B, C, H, W = x.shape
    ph, pw = H // PATCH, W // PATCH
    xr = x.reshape(B, C, ph, PATCH, pw, PATCH)
    xr = jnp.transpose(xr, (1, 3, 5, 0, 2, 4))            # [C,14,14,B,ph,pw]
    pT = xr.reshape(C * PATCH * PATCH, B * ph * pw).astype(jnp.bfloat16)
    kp, M = pT.shape
    return jnp.pad(pT, ((0, kp_pad - kp), (0, m_pad - M)))


def interp_matrix(out_size, in_size):
    # Separable bilinear weights matching F.interpolate(align_corners=True).
    if in_size == 1:
        return jnp.ones((out_size, 1), jnp.float32)
    i = jnp.arange(out_size, dtype=jnp.float32)
    if out_size == 1:
        src = jnp.zeros((1,), jnp.float32)
    else:
        src = i * (in_size - 1) / (out_size - 1)
    i0 = jnp.clip(jnp.floor(src).astype(jnp.int32), 0, in_size - 2)
    frac = src - i0.astype(jnp.float32)
    oh0 = jax.nn.one_hot(i0, in_size, dtype=jnp.float32)
    oh1 = jax.nn.one_hot(i0 + 1, in_size, dtype=jnp.float32)
    return (1.0 - frac)[:, None] * oh0 + frac[:, None] * oh1


def init_params(key):
    k1, k2, k3 = jax.random.split(key, 3)
    kp = IN_CH * PATCH * PATCH
    w1 = jax.random.normal(k1, (kp, EMBED), jnp.float32) * 0.02
    b1 = jax.random.normal(k3, (1, EMBED), jnp.float32) * 0.01
    w2 = jax.random.normal(k2, (EMBED, 1), jnp.float32) * 0.02
    b2 = jnp.full((1, 1), 0.1, jnp.float32)
    return w1, b1, w2, b2


@jax.jit
def asymkd_student_forward(x, w1, b1, w2, b2):
    B, C, H, W = x.shape
    ph, pw = H // PATCH, W // PATCH
    kp = C * PATCH * PATCH
    kp_pad = _round_up(kp, 16)              # bf16 sublane quantum (592), not 128
    M = B * ph * pw
    Ho, Wo = ph * PATCH, pw * PATCH
    cap = _vmem_capacity_bytes()

    # ---- Stage 1 tiling: tokens on lanes, tile tm (multiple of 128); keep at
    # least 2 tiles when M allows so both TCs work on dual-TC chips (v7x). ----
    min_tiles = 2 if M >= 256 else 1
    num_tiles = max(min_tiles, _cdiv(M, TM_MAX))
    tm = _round_up(_cdiv(M, num_tiles), 128)
    m_pad = tm * num_tiles

    pT = patchify_transposed(x, kp_pad, m_pad)            # (kp_pad, m_pad) bf16
    w1T = jnp.pad(w1.T, ((0, 0), (0, kp_pad - kp))).astype(jnp.bfloat16)
    b1_col = b1.reshape(EMBED, 1)

    k1_bytes = (2 * kp_pad * tm * 2 + 2 * EMBED * kp_pad * 2
                + 4 * EMBED * 4 + 2 * tm * 4 + EMBED * tm * 4)
    k1_limit = min(cap, max(32 << 20, k1_bytes + (8 << 20)))
    depth_tok = run_encoder_decoder(pT, w1T, b1_col, w2, b2, tm, k1_limit)
    # Padded token columns hold garbage (relu(b1)·w2 + b2); slice them off.
    depth_lr = depth_tok[0, :M].reshape(B, ph, pw)

    # ---- Stage 2: bilinear (align_corners=True) upsample to (ph*14, pw*14)
    # + ReLU.  Batch tile Bt sized from the double-buffered VMEM footprint. ----
    wh = interp_matrix(Ho, ph)                            # (Ho, ph)
    wwT = interp_matrix(Wo, pw).T                         # (pw, Wo)
    per_bt = 2 * ph * pw * 4 + 2 * Ho * Wo * 4 + ph * Wo * 4
    fixed = 2 * (pw * Wo + Ho * ph) * 4
    budget = max(per_bt + fixed, int(cap * 0.6))
    bt_max = max(1, (budget - fixed) // per_bt)
    if B >= 2:
        bt_max = min(bt_max, B // 2)                      # >=2 grid steps (v7x)
    bt_max = max(1, min(bt_max, B))
    bt = max(d for d in range(1, bt_max + 1) if B % d == 0)
    k2_bytes = fixed + bt * per_bt
    k2_limit = min(cap, max(32 << 20, k2_bytes + (8 << 20)))
    return run_upsample_relu(depth_lr, wwT, wh, bt, k2_limit)   # (B,1,Ho,Wo)


def reference_forward(x, w1, b1, w2, b2):
    # Plain-JAX reference of the same math (same bf16 cast on the patch matmul).
    B, C, H, W = x.shape
    ph, pw = H // PATCH, W // PATCH
    xr = x.reshape(B, C, ph, PATCH, pw, PATCH)
    patches = jnp.transpose(xr, (0, 2, 4, 1, 3, 5)).reshape(
        B * ph * pw, C * PATCH * PATCH)
    h = jnp.dot(patches.astype(jnp.bfloat16), w1.astype(jnp.bfloat16),
                preferred_element_type=jnp.float32) + b1
    h = jnp.maximum(h, 0.0)
    d = (h @ w2 + b2).reshape(B, ph, pw)
    wh = interp_matrix(ph * PATCH, ph)
    ww = interp_matrix(pw * PATCH, pw)
    out = jnp.einsum("op,bpq,wq->bow", wh, d, ww)
    return jnp.maximum(out, 0.0)[:, None, :, :]


if __name__ == "__main__":
    key = jax.random.PRNGKey(0)
    kx, kparam = jax.random.split(key)

    B, H, W = 2, 28, 28            # patch_h = patch_w = 2
    x = jax.random.normal(kx, (B, IN_CH, H, W), jnp.float32)
    w1, b1, w2, b2 = init_params(kparam)

    depth = asymkd_student_forward(x, w1, b1, w2, b2)
    depth = jax.block_until_ready(depth)

    ref = reference_forward(x, w1, b1, w2, b2)
    assert depth.shape == (B, 1, H, W), depth.shape
    max_err = float(jnp.max(jnp.abs(depth - ref)))
    assert jnp.allclose(depth, ref, atol=2e-3, rtol=2e-3), max_err

    print("KERNEL_OK")
</pallas_src>

<mosaic_0001>
module attributes {stable_mosaic.version = 11 : i64} {
  func.func @enc_dec_kernel(%arg0: i32, %arg1: memref<592x128xbf16, #tpu.memory_space<vmem>>, %arg2: memref<32x592xbf16, #tpu.memory_space<vmem>>, %arg3: memref<32x1xf32, #tpu.memory_space<vmem>>, %arg4: memref<32x1xf32, #tpu.memory_space<vmem>>, %arg5: memref<1x1xf32, #tpu.memory_space<smem>>, %arg6: memref<1x128xf32, #tpu.memory_space<vmem>>) attributes {dimension_semantics = [#tpu.dimension_semantics<parallel>], iteration_bounds = array<i64: 1>, scalar_prefetch = 0 : i64, scratch_operands = 0 : i64, tpu.core_type = #tpu.core_type<tc>, window_params = [{transform_indices = @transform_0, window_bounds = array<i64: 592, 128>}, {pipeline_mode = #tpu.pipeline_mode<synchronous>, transform_indices = @transform_1, window_bounds = array<i64: 32, 592>}, {pipeline_mode = #tpu.pipeline_mode<synchronous>, transform_indices = @transform_2, window_bounds = array<i64: 32, 1>}, {pipeline_mode = #tpu.pipeline_mode<synchronous>, transform_indices = @transform_3, window_bounds = array<i64: 32, 1>}, {transform_indices = @transform_4, window_bounds = array<i64: 1, 1>}, {transform_indices = @transform_5, window_bounds = array<i64: 1, 128>}]} {
    %c0 = arith.constant 0 : index
    %c0_0 = arith.constant 0 : index
    %0 = vector.load %arg2[%c0, %c0_0] : memref<32x592xbf16, #tpu.memory_space<vmem>>, vector<32x592xbf16>
    %c0_1 = arith.constant 0 : index
    %c0_2 = arith.constant 0 : index
    %1 = vector.load %arg1[%c0_1, %c0_2] : memref<592x128xbf16, #tpu.memory_space<vmem>>, vector<592x128xbf16>
    %cst = arith.constant dense<0.000000e+00> : vector<32x128xf32>
    %2 = tpu.matmul %0, %1, %cst {dimension_numbers = #tpu.dot_dimension_numbers<[1], [0], [0], [1], [0, 0, 1, 1], [], []>} : vector<32x592xbf16>, vector<592x128xbf16>, vector<32x128xf32> -> vector<32x128xf32>
    %c0_3 = arith.constant 0 : index
    %c0_4 = arith.constant 0 : index
    %3 = vector.load %arg3[%c0_3, %c0_4] : memref<32x1xf32, #tpu.memory_space<vmem>>, vector<32x1xf32>
    %4 = vector.broadcast %3 : vector<32x1xf32> to vector<32x128xf32>
    %5 = arith.addf %2, %4 : vector<32x128xf32>
    %cst_5 = arith.constant 0.000000e+00 : f32
    %6 = vector.broadcast %cst_5 : f32 to vector<32x128xf32>
    %7 = arith.maximumf %5, %6 : vector<32x128xf32>
    %c0_6 = arith.constant 0 : index
    %c0_7 = arith.constant 0 : index
    %8 = vector.load %arg4[%c0_6, %c0_7] : memref<32x1xf32, #tpu.memory_space<vmem>>, vector<32x1xf32>
    %9 = vector.broadcast %8 : vector<32x1xf32> to vector<32x128xf32>
    %10 = arith.mulf %7, %9 : vector<32x128xf32>
    %cst_8 = arith.constant dense<0.000000e+00> : vector<128xf32>
    %11 = vector.multi_reduction <add>, %10, %cst_8 [0] : vector<32x128xf32> to vector<128xf32>
    %12 = vector.shape_cast %11 : vector<128xf32> to vector<1x128xf32>
    %c0_9 = arith.constant 0 : index
    %c0_10 = arith.constant 0 : index
    %13 = memref.load %arg5[%c0_9, %c0_10] : memref<1x1xf32, #tpu.memory_space<smem>>
    %14 = vector.broadcast %13 : f32 to vector<1x128xf32>
    %15 = arith.addf %12, %14 : vector<1x128xf32>
    %c0_11 = arith.constant 0 : index
    %c0_12 = arith.constant 0 : index
    %16 = vector.load %arg6[%c0_11, %c0_12] : memref<1x128xf32, #tpu.memory_space<vmem>>, vector<1x128xf32>
    tpu.vector_store %arg6[%c0_11, %c0_12], %15 {strides = array<i32>} : memref<1x128xf32, #tpu.memory_space<vmem>>, vector<1x128xf32>,
    return
  }
  func.func @transform_0(%arg0: i32) -> (i32, i32) {
    %c0_i32 = arith.constant 0 : i32
    %c0_i32_0 = arith.constant 0 : i32
    return %c0_i32, %arg0 : i32, i32
  }
  func.func @transform_1(%arg0: i32) -> (i32, i32) {
    %c0_i32 = arith.constant 0 : i32
    %c0_i32_0 = arith.constant 0 : i32
    %c0_i32_1 = arith.constant 0 : i32
    return %c0_i32, %c0_i32_0 : i32, i32
  }
  func.func @transform_2(%arg0: i32) -> (i32, i32) {
    %c0_i32 = arith.constant 0 : i32
    %c0_i32_0 = arith.constant 0 : i32
    %c0_i32_1 = arith.constant 0 : i32
    return %c0_i32, %c0_i32_0 : i32, i32
  }
  func.func @transform_3(%arg0: i32) -> (i32, i32) {
    %c0_i32 = arith.constant 0 : i32
    %c0_i32_0 = arith.constant 0 : i32
    %c0_i32_1 = arith.constant 0 : i32
    return %c0_i32, %c0_i32_0 : i32, i32
  }
  func.func @transform_4(%arg0: i32) -> (i32, i32) {
    %c0_i32 = arith.constant 0 : i32
    %c0_i32_0 = arith.constant 0 : i32
    %c0_i32_1 = arith.constant 0 : i32
    return %c0_i32, %c0_i32_0 : i32, i32
  }
  func.func @transform_5(%arg0: i32) -> (i32, i32) {
    %c0_i32 = arith.constant 0 : i32
    %c0_i32_0 = arith.constant 0 : i32
    return %c0_i32, %arg0 : i32, i32
  }
}

module attributes {stable_mosaic.version = 11 : i64} {
  func.func @upsample_relu_kernel(%arg0: i32, %arg1: memref<1x2x2xf32, #tpu.memory_space<vmem>>, %arg2: memref<2x28xf32, #tpu.memory_space<vmem>>, %arg3: memref<28x2xf32, #tpu.memory_space<vmem>>, %arg4: memref<1x1x28x28xf32, #tpu.memory_space<vmem>>) attributes {dimension_semantics = [#tpu.dimension_semantics<parallel>], iteration_bounds = array<i64: 2>, scalar_prefetch = 0 : i64, scratch_operands = 0 : i64, tpu.core_type = #tpu.core_type<tc>, window_params = [{transform_indices = @transform_0, window_bounds = array<i64: 1, 2, 2>}, {pipeline_mode = #tpu.pipeline_mode<synchronous>, transform_indices = @transform_1, window_bounds = array<i64: 2, 28>}, {pipeline_mode = #tpu.pipeline_mode<synchronous>, transform_indices = @transform_2, window_bounds = array<i64: 28, 2>}, {transform_indices = @transform_3, window_bounds = array<i64: 1, 1, 28, 28>}]} {
    %c0 = arith.constant 0 : index
    %c0_0 = arith.constant 0 : index
    %0 = vector.load %arg2[%c0, %c0_0] : memref<2x28xf32, #tpu.memory_space<vmem>>, vector<2x28xf32>
    %c0_1 = arith.constant 0 : index
    %c0_2 = arith.constant 0 : index
    %1 = vector.load %arg3[%c0_1, %c0_2] : memref<28x2xf32, #tpu.memory_space<vmem>>, vector<28x2xf32>
    %c0_3 = arith.constant 0 : index
    %c0_4 = arith.constant 0 : index
    %c0_5 = arith.constant 0 : index
    %2 = vector.load %arg1[%c0_3, %c0_4, %c0_5] : memref<1x2x2xf32, #tpu.memory_space<vmem>>, vector<1x2x2xf32>
    %3 = vector.shape_cast %2 : vector<1x2x2xf32> to vector<2x2xf32>
    %cst = arith.constant dense<0.000000e+00> : vector<2x28xf32>
    %4 = tpu.matmul %3, %0, %cst {dimension_numbers = #tpu.dot_dimension_numbers<[1], [0], [0], [1], [0, 0, 1, 1], [], []>} : vector<2x2xf32>, vector<2x28xf32>, vector<2x28xf32> -> vector<2x28xf32>
    %cst_6 = arith.constant dense<0.000000e+00> : vector<28x28xf32>
    %5 = tpu.matmul %1, %4, %cst_6 {dimension_numbers = #tpu.dot_dimension_numbers<[1], [0], [0], [1], [0, 0, 1, 1], [], []>} : vector<28x2xf32>, vector<2x28xf32>, vector<28x28xf32> -> vector<28x28xf32>
    %cst_7 = arith.constant 0.000000e+00 : f32
    %6 = vector.broadcast %cst_7 : f32 to vector<28x28xf32>
    %7 = arith.maximumf %5, %6 : vector<28x28xf32>
    %c0_8 = arith.constant 0 : index
    %c0_9 = arith.constant 0 : index
    %c0_10 = arith.constant 0 : index
    %c0_11 = arith.constant 0 : index
    %8 = vector.load %arg4[%c0_8, %c0_9, %c0_10, %c0_11] : memref<1x1x28x28xf32, #tpu.memory_space<vmem>>, vector<1x1x28x28xf32>
    %9 = vector.shape_cast %8 : vector<1x1x28x28xf32> to vector<28x28xf32>
    %10 = vector.shape_cast %7 : vector<28x28xf32> to vector<1x1x28x28xf32>
    tpu.vector_store %arg4[%c0_8, %c0_9, %c0_10, %c0_11], %10 {strides = array<i32>} : memref<1x1x28x28xf32, #tpu.memory_space<vmem>>, vector<1x1x28x28xf32>,
    return
  }
  func.func @transform_0(%arg0: i32) -> (i32, i32, i32) {
    %c0_i32 = arith.constant 0 : i32
    %c0_i32_0 = arith.constant 0 : i32
    %c0_i32_1 = arith.constant 0 : i32
    return %arg0, %c0_i32, %c0_i32_0 : i32, i32, i32
  }
  func.func @transform_1(%arg0: i32) -> (i32, i32) {
    %c0_i32 = arith.constant 0 : i32
    %c0_i32_0 = arith.constant 0 : i32
    %c0_i32_1 = arith.constant 0 : i32
    return %c0_i32, %c0_i32_0 : i32, i32
  }
  func.func @transform_2(%arg0: i32) -> (i32, i32) {
    %c0_i32 = arith.constant 0 : i32
    %c0_i32_0 = arith.constant 0 : i32
    %c0_i32_1 = arith.constant 0 : i32
    return %c0_i32, %c0_i32_0 : i32, i32
  }
  func.func @transform_3(%arg0: i32) -> (i32, i32, i32, i32) {
    %c0_i32 = arith.constant 0 : i32
    %c0_i32_0 = arith.constant 0 : i32
    %c0_i32_1 = arith.constant 0 : i32
    %c0_i32_2 = arith.constant 0 : i32
    return %arg0, %c0_i32, %c0_i32_0, %c0_i32_1 : i32, i32, i32, i32
  }
}

</mosaic_0001>

<bundles_post_ra>
// kernel: squeeze.1
= control target key start
LH: loop header
LB: loop body
LE: loop exit
PB: predicated region body
PF: predicated region fallthrough
CT: control target
= control target key end

     0   :  { %vm7_vm0 = vcmask 15360   ;;  %s43_s8 = smov 122   ;;  %s44_s9 = smov 124   ;;  %s68_s0 = inlined_call_operand.vmem [shape: f32[8], index: 0, kind: input, shape index: {}]   ;;  %s69_s1 = inlined_call_operand.vmem [shape: f32[2,2,2], index: 1, kind: output, shape index: {}]  }
   0x1   :  { %v4_v0 = vld [vmem:[%s68_s0] sm:$0x1]  ;;  %s42_s0 = smov 126  }
   0x2   :  { %5 = vst [vmem:[#allocation1] sm:$0x1] %v4_v0 }
   0x9   :  { %v9_v1 = vld [vmem:[#allocation1] sm:$0x1]  }
   0xa   :  { %v21_v2 = vld [vmem:[#allocation1] sm:$0x1]   ;;  %10 = vrot.lane.b32.xlu0 %v9_v1, %s42_s0 }
   0xb   :  { %22 = vrot.lane.b32.xlu1 %v21_v2, %s43_s8  ;;  %v6_v3 = vld [vmem:[#allocation1] sm:$0x1]  }
   0xc   :  { %v15_v4 = vld [vmem:[#allocation1] sm:$0x1]   ;;  %8 = vst.msk [vmem:[#allocation0] sm:$0x1] %vm7_vm0, %v6_v3  }
   0xe   :  { %16 = vrot.lane.b32.xlu0 %v15_v4, %s44_s9 }
  0x7c   :  { %v11_v5 = vpop.permute.xlu0 %10  }
  0x7d   :  { %v23_v6 = vpop.permute.xlu1 %22   ;;  %14 = vst.msk [vmem:[#allocation0 + $0x1] sm:$0x1] %vm7_vm0, %v11_v5  }
  0x7e   :  { %26 = vst.msk [vmem:[#allocation0 + $0x9] sm:$0x1] %vm7_vm0, %v23_v6  }
  0x80   :  { %v17_v7 = vpop.permute.xlu0 %16  }
  0x81   :  { %20 = vst.msk [vmem:[#allocation0 + $0x8] sm:$0x1] %vm7_vm0, %v17_v7  }
  0x84   :  { %v30_v8 = vld [vmem:[#allocation0] sm:$0x3] }
  0x85   :  { %32 = vst [vmem:[%s69_s1] sm:$0x3] %v30_v8 }
  0x88   :  { %v34_v9 = vld [vmem:[#allocation0 + $0x8] sm:$0x3] }
  0x89   :  { %38 = vst [vmem:[%s69_s1 + $0x2] sm:$0x3] %v34_v9 }

// kernel: asymkd_student_forward.3
= control target key start
LH: loop header
LB: loop body
LE: loop exit
PB: predicated region body
PF: predicated region fallthrough
CT: control target
= control target key end

     0   :  { %s495_s12 = smov 0   ;;  %s530_s0 = inlined_call_operand.vmem [shape: f32[2,2,2], index: 0, kind: input, shape index: {}]   ;;  %s531_s1 = inlined_call_operand.vmem [shape: f32[2,28], index: 1, kind: input, shape index: {}]   ;;  %s532_s2 = inlined_call_operand.vmem [shape: f32[28,2], index: 2, kind: input, shape index: {}]   ;;  %s533_s3 = inlined_call_operand.vmem [shape: f32[2,1,28,28], index: 3, kind: output, shape index: {}]  }
   0x1 LB: > { %s417_s13 = sadd.s32 4294967295, %s471_s12   ;;  %p421_p0 = scmp.ge.s32.totalorder %s471_s12, 1  ;;  %s471_s12 = sphi %s495_s12, %s13_s12  }
   0x2   : > { %p136_p1 = scmp.lt.s32.totalorder %s471_s12, 3 }
   0x4   : > { %p137_p2 = pnand %p421_p0, %p136_p1 }
   0x5   : > { %v168_v0 = vld [vmem:[%s531_s1] sm:$0x3] (!%p137_p2)  ;;  %vm178_vm0 = vcmask (!%p137_p2), 1041408   ;;  %p159_p3 = scmp.lt.s32.totalorder (!%p137_p2), %s417_s13, 1  ;;  %v473_v1 = vmov (!%p137_p2), 0.0   ;;  %vm474_vm1 = vmmov (!%p137_p2), 0  }
   0x6   : > { %140 = sbr.rel (%p137_p2) target bundleno = 451 (0x1c3), region = 32  ;;  %442 = vmatprep.subr.mxu0 (!%p137_p2), %v473_v1  ;;  %444 = vmatprep.mubr.msk.f32.mxu0 (!%p137_p2), %vm474_vm1, %v473_v1  ;;  %vm174_vm2 = vcmask (!%p137_p2), 15360   ;;  %v169_v3 = vld [vmem:[%s532_s2] sm:$0xff] (!%p137_p2)  ;;  %v170_v5 = vld [vmem:[%s532_s2 + $0x8] sm:$0xff] (!%p137_p2)  ;;  %v171_v7 = vld [vmem:[%s532_s2 + $0x10] sm:$0xff] (!%p137_p2)  ;;  %vm356_vm3 = vcmask (!%p137_p2), 228352  }
   0x7   : > { %443 = vmatpush3.msk.msra.mxu0 (!%p137_p2), %vm178_vm0, %v168_v0  ;;  %449 = vmatprep.mubr.msk.f32.mxu1 (!%p137_p2), %vm174_vm2, %v169_v3  ;;  %v172_v8 = vld [vmem:[%s532_s2 + $0x18] sm:$0xf] (!%p137_p2)  ;;  %vm360_vm4 = vcmask (!%p137_p2), 224256  }
   0xd   : > { %s535_s13 = smov (!%p159_p3, %s417_s13), 1 }
   0xe   : > { %s422_s16 = sshll.u32 %s535_s13, 1  ;;  %s434_s28 = sshll.u32 %s535_s13, 5 }
   0xf   : > { %s162_s19 = scalar_lea.vmem %s530_s0, %s422_s16  ;;  %s167_s4 = scalar_lea.vmem %s533_s3, %s434_s28 }
  0x10   : > { %v173_v2 = vld [vmem:[%s162_s19] sm:$0x3] }
  0x11   : > { %445 = vmatmul.mubr.msk.f32.vlgmr.msra.gmra.mrb[0].mxu0 %vm174_vm2, %v173_v2 }
  0xe4   : > { %v248_v4 = vpop.f32.mrb[0].mxu0 }
  0xe5   : > { %v446_v6 = vpop.f32.mrb[1].mxu0  ;;  %447 = vmatprep.subr.msk.mxu1 %vm178_vm0, %v248_v4 }
  0xe6   : > { %448 = vmatpush3.msk.msra.mxu1 %vm178_vm0, %v248_v4 }
  0xe7   : > { %450 = vmatmul.mubr.msk.f32.vlgmr.msra.gmra.mrb[0].mxu1 %vm174_vm2, %v170_v5 }
  0xe8   : > { %452 = vmatprep.mubr.msk.f32.mxu1 %vm174_vm2, %v171_v7 }
  0xeb   : > { %453 = vmatmul.mubr.msk.f32.gmra.mrb[2].mxu1 %vm174_vm2, %v172_v8 }
 0x1ba   : > { %v451_v9 = vpop.f32.mrb[0].mxu1 }
 0x1bb   : > { %v353_v10 = vmax.f32 %v451_v9, 0.0  ;;  %v333_v11 = vpop.f32.mrb[1].mxu1 }
 0x1bc   : > { %v352_v12 = vmax.f32 %v333_v11, 0.0 }
 0x1bd   : > { %358 = vst.msk [vmem:[%s167_s4 + $0x8] sm:$0xff] %vm356_vm3, %v353_v10 }
 0x1be   : > { %357 = vst.msk [vmem:[%s167_s4] sm:$0xff] %vm356_vm3, %v352_v12  ;;  %v454_v13 = vpop.f32.mrb[2].mxu1 }
 0x1bf   : > { %v355_v14 = vmax.f32 %v454_v13, 0.0  ;;  %v343_v15 = vpop.f32.mrb[3].mxu1 }
 0x1c0   : > { %v354_v16 = vmax.f32 %v343_v15, 0.0 }
 0x1c1   : > { %361 = vst.msk [vmem:[%s167_s4 + $0x18] sm:$0xf] %vm360_vm4, %v355_v14 }
 0x1c2   : > { %359 = vst.msk [vmem:[%s167_s4 + $0x10] sm:$0xff] %vm356_vm3, %v354_v16 }
 0x1c3 PF: > { %s13_s12 = sadd.s32 1, %s471_s12  }
 0x1c4   : > { %p10_p4 = scmp.ge.s32.totalorder %s13_s12, 4  }
 0x1c6   :  { %12 = sbr.rel (!%p10_p4) target bundleno = 1 (0x1), region = 62 }

// kernel: asymkd_student_forward.2
= control target key start
LH: loop header
LB: loop body
LE: loop exit
PB: predicated region body
PF: predicated region fallthrough
CT: control target
= control target key end

     0   :  { %v787_v1 = vmov 0   ;;  %vm404_vm0 = vcmask 654336   ;;  %s991_s0 = inlined_call_operand.vmem [shape: bf16[592,128], index: 0, kind: input, shape index: {}]   ;;  %s992_s1 = inlined_call_operand.vmem [shape: bf16[32,592], index: 1, kind: input, shape index: {}]   ;;  %s993_s2 = inlined_call_operand.vmem [shape: f32[32,1], index: 2, kind: input, shape index: {}]   ;;  %s994_s3 = inlined_call_operand.vmem [shape: f32[32,1], index: 3, kind: input, shape index: {}]   ;;  %s995_s4 = inlined_call_operand.<no memory space> [shape: f32[1,1], index: 4, kind: input, shape index: {}]   ;;  %s996_s5 = inlined_call_operand.vmem [shape: f32[1,128], index: 5, kind: output, shape index: {}]  }
   0x1   :  { %v736_v0 = vld [vmem:[%s991_s0 + $0x40] sm:$0xff]   ;;  %734 = vset.pattern.permute.xlu0 %v787_v1  ;;  %735 = vset.pattern.permute.xlu1 %v787_v1  ;;  %v740_v5 = vld [vmem:[%s991_s0 + $0x48] sm:$0xff]   ;;  %v744_v9 = vld [vmem:[%s991_s0 + $0x50] sm:$0xff]  }
   0x2   :  { %v737_v2 = vld [vmem:[%s991_s0] sm:$0xff]   ;;  %656 = vmatprep.subr.bf16.mxu0 %v736_v0  ;;  %v741_v6 = vld [vmem:[%s991_s0 + $0x8] sm:$0xff]   ;;  %v745_v10 = vld [vmem:[%s991_s0 + $0x10] sm:$0xff]  }
   0x3   :  { %v738_v3 = vld [vmem:[%s991_s0 + $0xc0] sm:$0xff]   ;;  %657 = vmatpush3.bf16.msra.mxu0 %v737_v2  ;;  %v742_v7 = vld [vmem:[%s991_s0 + $0xc8] sm:$0xff]   ;;  %v746_v11 = vld [vmem:[%s991_s0 + $0xd0] sm:$0xff]  }
   0x4   :  { %v739_v4 = vld [vmem:[%s991_s0 + $0x80] sm:$0xff]   ;;  %684 = vmatprep.subr.bf16.mxu1 %v738_v3  ;;  %658 = vmatprep.subr.bf16.mxu0 %v740_v5  ;;  %v743_v8 = vld [vmem:[%s991_s0 + $0x88] sm:$0xff]   ;;  %v747_v12 = vld [vmem:[%s991_s0 + $0x90] sm:$0xff]  }
   0x5   :  { %685 = vmatpush3.bf16.msra.mxu1 %v739_v4  ;;  %v748_v13 = vld [vmem:[%s991_s0 + $0x58] sm:$0xff]   ;;  %v752_v17 = vld [vmem:[%s991_s0 + $0x60] sm:$0xff]   ;;  %v756_v21 = vld [vmem:[%s991_s0 + $0x68] sm:$0xff]  }
   0x6   :  { %686 = vmatprep.subr.bf16.mxu1 %v742_v7  ;;  %v749_v14 = vld [vmem:[%s991_s0 + $0x18] sm:$0xff]   ;;  %v753_v18 = vld [vmem:[%s991_s0 + $0x20] sm:$0xff]   ;;  %v757_v22 = vld [vmem:[%s991_s0 + $0x28] sm:$0xff]  }
   0x7   :  { %659 = vmatpush3.bf16.msra.mxu0 %v741_v6  ;;  %v750_v15 = vld [vmem:[%s991_s0 + $0xd8] sm:$0xff]   ;;  %v754_v19 = vld [vmem:[%s991_s0 + $0xe0] sm:$0xff]   ;;  %v758_v23 = vld [vmem:[%s991_s0 + $0xe8] sm:$0xff]  }
   0x8   :  { %660 = vmatprep.subr.bf16.mxu0 %v744_v9  ;;  %v751_v16 = vld [vmem:[%s991_s0 + $0x98] sm:$0xff]   ;;  %v755_v20 = vld [vmem:[%s991_s0 + $0xa0] sm:$0xff]   ;;  %v759_v24 = vld [vmem:[%s991_s0 + $0xa8] sm:$0xff]  }
   0x9   :  { %687 = vmatpush3.bf16.msra.mxu1 %v743_v8  ;;  %v760_v25 = vld [vmem:[%s991_s0 + $0x70] sm:$0xff]   ;;  %v764_v29 = vld [vmem:[%s991_s0 + $0x78] sm:$0xff]   ;;  %v771_v35 = vld [vmem:[%s991_s0 + $0x100] sm:$0xff]  }
   0xa   :  { %688 = vmatprep.subr.bf16.mxu1 %v746_v11  ;;  %v761_v26 = vld [vmem:[%s991_s0 + $0x30] sm:$0xff]   ;;  %v765_v30 = vld [vmem:[%s991_s0 + $0x38] sm:$0xff]   ;;  %v774_v37 = vld [vmem:[%s992_s1 + $0xc] ss:$20 sps:$4 sm:$0xff]  }
   0xb   :  { %661 = vmatpush3.bf16.msra.mxu0 %v745_v10  ;;  %v762_v27 = vld [vmem:[%s991_s0 + $0xf0] sm:$0xff]   ;;  %v766_v31 = vld [vmem:[%s991_s0 + $0xf8] sm:$0xff]   ;;  %v775_v38 = vld [vmem:[%s991_s0 + $0x108] sm:$0xff]   ;;  %492 = vmatprep.mubr.bf16.mxu1 %v774_v37 }
   0xc   :  { %662 = vmatprep.subr.bf16.mxu0 %v748_v13  ;;  %v763_v28 = vld [vmem:[%s991_s0 + $0xb0] sm:$0xff]   ;;  %v769_v33 = vld [vmem:[%s992_s1 + $0x4] ss:$20 sps:$4 sm:$0xff]   ;;  %v772_v36 = vld [vmem:[%s992_s1 + $0x8] ss:$20 sps:$4 sm:$0xff]  }
   0xd   :  { %689 = vmatpush3.bf16.msra.mxu1 %v747_v12  ;;  %v767_v32 = vld [vmem:[%s992_s1] ss:$20 sps:$4 sm:$0xff]   ;;  %v770_v34 = vld [vmem:[%s991_s0 + $0xb8] sm:$0xff]   ;;  %443 = vmatprep.mubr.bf16.mxu0 %v769_v33  ;;  %v782_v43 = vld [vmem:[%s992_s1 + $0x30] ss:$20 sps:$4 sm:$0xff]  }
   0xe   :  { %690 = vmatprep.subr.bf16.mxu1 %v750_v15  ;;  %v776_v39 = vld [vmem:[%s992_s1 + $0x2c] ss:$20 sps:$4 sm:$0xff]   ;;  %v778_v40 = vld [vmem:[%s991_s0 + $0x110] sm:$0xff]   ;;  %v779_v41 = vld [vmem:[%s992_s1 + $0x28] ss:$20 sps:$4 sm:$0xff]  }
   0xf   :  { %663 = vmatpush3.bf16.msra.mxu0 %v749_v14  ;;  %v780_v42 = vld [vmem:[%s992_s1 + $0x34] ss:$20 sps:$4 sm:$0xff]   ;;  %v783_v44 = vld [vmem:[%s991_s0 + $0x118] sm:$0xff]   ;;  %v785_v45 = vld [vmem:[%s992_s1 + $0x10] ss:$20 sps:$4 sm:$0xff]  }
  0x10   :  { %664 = vmatprep.subr.bf16.mxu0 %v752_v17  ;;  %v108_v46 = vld [vmem:[%s993_s2] sm:$0xff]  ;;  %v110_v47 = vld [vmem:[%s993_s2 + $0x10] sm:$0xff]  ;;  %v109_v49 = vld [vmem:[%s993_s2 + $0x8] sm:$0xff] }
  0x11   :  { %691 = vmatpush3.bf16.msra.mxu1 %v751_v16  ;;  %v784_v48 = vld [vmem:[%s991_s0 + $0x120] sm:$0xff]   ;;  %114 = vperm.xlu0 %734, %v108_v46   ;;  %v111_v50 = vld [vmem:[%s993_s2 + $0x18] sm:$0xff]  ;;  %v563_v53 = vld [vmem:[%s994_s3 + $0x8] sm:$0xff] }
  0x12   :  { %692 = vmatprep.subr.bf16.mxu1 %v754_v19  ;;  %124 = vperm.xlu1 %735, %v110_v47   ;;  %v786_v51 = vld [vmem:[%s992_s1 + $0x38] ss:$20 sps:$4 sm:$0xff]   ;;  %v562_v52 = vld [vmem:[%s994_s3] sm:$0xff]  ;;  %v564_v54 = vld [vmem:[%s994_s3 + $0x10] sm:$0xff] }
  0x13   :  { %665 = vmatpush3.bf16.msra.mxu0 %v753_v18  ;;  %v565_v55 = vld [vmem:[%s994_s3 + $0x18] sm:$0xff] }
  0x14   :  { %666 = vmatprep.subr.bf16.mxu0 %v756_v21 }
  0x15   :  { %693 = vmatpush3.bf16.msra.mxu1 %v755_v20  ;;  %119 = vperm.xlu0 %734, %v109_v49  }
  0x16   :  { %694 = vmatprep.subr.bf16.mxu1 %v758_v23  ;;  %129 = vperm.xlu1 %735, %v111_v50  }
  0x17   :  { %667 = vmatpush3.bf16.msra.mxu0 %v757_v22 }
  0x18   :  { %668 = vmatprep.subr.bf16.mxu0 %v760_v25 }
  0x19   :  { %695 = vmatpush3.bf16.msra.mxu1 %v759_v24  ;;  %568 = vperm.xlu0 %734, %v562_v52  }
  0x1a   :  { %696 = vmatprep.subr.bf16.mxu1 %v762_v27  ;;  %573 = vperm.xlu1 %735, %v563_v53  }
  0x1b   :  { %669 = vmatpush3.bf16.msra.mxu0 %v761_v26 }
  0x1c   :  { %670 = vmatprep.subr.bf16.mxu0 %v764_v29 }
  0x1d   :  { %697 = vmatpush3.bf16.msra.mxu1 %v763_v28  ;;  %578 = vperm.xlu0 %734, %v564_v54  }
  0x1e   :  { %698 = vmatprep.subr.bf16.mxu1 %v766_v31  ;;  %583 = vperm.xlu1 %735, %v565_v55  }
  0x1f   :  { %671 = vmatpush3.bf16.msra.mxu0 %v765_v30 }
  0x20   :  { %719 = vmatprep.subr.bf16.mxu0 %v771_v35 }
  0x21   :  { %699 = vmatpush3.bf16.msra.mxu1 %v770_v34 }
  0x22   :  { %444 = vmatmul.mubr.bf16.vlgmr.msra.gmra.mrb[0].mxu0 %v767_v32 }
  0x23   :  { %720 = vmatpush3.bf16.msra.mxu0 %v771_v35  ;;  %451 = vmatprep.mubr.bf16.mxu0 %v776_v39 }
  0x24   :  { %493 = vmatmul.mubr.bf16.vlgmr.msra.gmra.mrb[0].mxu1 %v772_v36  ;;  %721 = vmatprep.subr.bf16.mxu0 %v775_v38 }
  0x25   :  { %500 = vmatprep.mubr.bf16.mxu1 %v780_v42 }
  0x27   :  { %722 = vmatpush3.bf16.msra.mxu0 %v775_v38 }
  0x28   :  { %723 = vmatprep.subr.bf16.mxu0 %v778_v40 }
  0x2a   :  { %452 = vmatmul.mubr.bf16.gmra.mrb[4].mxu0 %v779_v41 }
  0x2b   :  { %724 = vmatpush3.bf16.msra.mxu0 %v778_v40  ;;  %729 = vmatprep.mubr.msk.bf16.mxu0 %vm404_vm0, %v785_v45 }
  0x2c   :  { %501 = vmatmul.mubr.bf16.gmra.mrb[4].mxu1 %v782_v43  ;;  %725 = vmatprep.subr.bf16.mxu0 %v783_v44 }
  0x2f   :  { %726 = vmatpush3.bf16.msra.mxu0 %v783_v44 }
  0x30   :  { %727 = vmatprep.subr.bf16.mxu0 %v784_v48 }
  0x33   :  { %728 = vmatpush3.bf16.msra.mxu0 %v784_v48 }
  0x36   :  { %730 = vmatmul.mubr.msk.bf16.vlgmr.msra.gmra.mrb[8].mxu0 %vm404_vm0, %v786_v51 }
  0x90   :  { %v115_v56 = vpop.permute.xlu0 %114 }
  0x91   :  { %v125_v8 = vpop.permute.xlu1 %124 }
  0x94   :  { %v120_v61 = vpop.permute.xlu0 %119 }
  0x95   :  { %v130_v20 = vpop.permute.xlu1 %129 }
  0x98   :  { %v569_v33 = vpop.permute.xlu0 %568 }
  0x99   :  { %v574_v38 = vpop.permute.xlu1 %573 }
  0x9c   :  { %v579_v44 = vpop.permute.xlu0 %578 }
  0x9d   :  { %v584_v47 = vpop.permute.xlu1 %583 }
  0xf5   :  { %v672_v57 = vpop.f32.mrb[0].mxu0 }
  0xf6   :  { %v673_v58 = vpop.f32.mrb[1].mxu0 }
  0xf7   :  { %v674_v59 = vadd.f32 %v673_v58, %v672_v57  ;;  %v675_v60 = vpop.f32.mrb[2].mxu0  ;;  %v700_v62 = vpop.f32.mrb[0].mxu1 }
  0xf8   :  { %v676_v63 = vpop.f32.mrb[3].mxu0  ;;  %v701_v2 = vpop.f32.mrb[1].mxu1 }
  0xf9   :  { %v446_v0 = vadd.f32 %v674_v59, %v115_v56  ;;  %v677_v1 = vadd.f32 %v676_v63, %v675_v60  ;;  %v702_v3 = vadd.f32 %v701_v2, %v700_v62  ;;  %v703_v4 = vpop.f32.mrb[2].mxu1  ;;  %v600_v56 = vstv %s995_s4 }
  0xfa   :  { %v704_v6 = vpop.f32.mrb[3].mxu1 }
  0xfb   :  { %v449_v5 = vadd.f32 %v677_v1, %v120_v61  ;;  %v705_v7 = vadd.f32 %v704_v6, %v703_v4  ;;  %v495_v9 = vadd.f32 %v702_v3, %v446_v0 }
  0xfd   :  { %v678_v10 = vpop.f32.mrb[4].mxu0  ;;  %v498_v12 = vadd.f32 %v705_v7, %v449_v5 }
  0xfe   :  { %v679_v11 = vpop.f32.mrb[5].mxu0 }
  0xff   :  { %v680_v13 = vadd.f32 %v679_v11, %v678_v10  ;;  %v681_v14 = vpop.f32.mrb[6].mxu0  ;;  %v706_v15 = vpop.f32.mrb[4].mxu1 }
 0x100   :  { %v682_v16 = vpop.f32.mrb[7].mxu0  ;;  %v707_v19 = vpop.f32.mrb[5].mxu1 }
 0x101   :  { %v454_v17 = vadd.f32 %v680_v13, %v125_v8  ;;  %v683_v18 = vadd.f32 %v682_v16, %v681_v14  ;;  %v708_v21 = vadd.f32 %v707_v19, %v706_v15  ;;  %v709_v22 = vpop.f32.mrb[6].mxu1 }
 0x102   :  { %v710_v24 = vpop.f32.mrb[7].mxu1 }
 0x103   :  { %v457_v23 = vadd.f32 %v683_v18, %v130_v20  ;;  %v711_v25 = vadd.f32 %v710_v24, %v709_v22  ;;  %v503_v26 = vadd.f32 %v708_v21, %v454_v17 }
 0x105   :  { %v506_v27 = vadd.f32 %v711_v25, %v457_v23 }
 0x109   :  { %v731_v28 = vpop.f32.mrb[8].mxu0 }
 0x10a   :  { %v552_v29 = vadd.f32 %v731_v28, %v503_v26  ;;  %v543_v30 = vpop.f32.mrb[9].mxu0 }
 0x10b   :  { %v544_v31 = vadd.f32 %v543_v30, %v495_v9  ;;  %v732_v32 = vpop.f32.mrb[10].mxu0 }
 0x10c   :  { %v555_v34 = vadd.f32 %v732_v32, %v506_v27  ;;  %v546_v35 = vpop.f32.mrb[11].mxu0  ;;  %v560_v39 = vmax.f32 %v552_v29, 0.0 }
 0x10d   :  { %v558_v36 = vmax.f32 %v544_v31, 0.0  ;;  %v547_v37 = vadd.f32 %v546_v35, %v498_v12 }
 0x10e   :  { %v561_v42 = vmax.f32 %v555_v34, 0.0  ;;  %v588_v45 = vmul.f32 %v579_v44, %v560_v39 }
 0x10f   :  { %v559_v40 = vmax.f32 %v547_v37, 0.0  ;;  %v586_v41 = vmul.f32 %v569_v33, %v558_v36 }
 0x110   :  { %v589_v48 = vmul.f32 %v584_v47, %v561_v42 }
 0x111   :  { %v587_v43 = vmul.f32 %v574_v38, %v559_v40 }
 0x113   :  { %v590_v46 = vadd.f32 %v587_v43, %v586_v41 }
 0x115   :  { %v591_v49 = vadd.f32 %v590_v46, %v588_v45 }
 0x117   :  { %v592_v50 = vadd.f32 %v591_v49, %v589_v48 }
 0x119   :  { %v593_v51 = vrot.slane %v592_v50, 4 }
 0x11b   :  { %v594_v52 = vadd.f32 %v593_v51, %v592_v50 }
 0x11d   :  { %v595_v53 = vrot.slane %v594_v52, 2 }
 0x11f   :  { %v596_v54 = vadd.f32 %v595_v53, %v594_v52 }
 0x121   :  { %v597_v55 = vrot.slane %v596_v54, 1 }
 0x123   :  { %v598_v57 = vadd.f32 %v597_v55, %v596_v54 }
 0x125   :  { %v601_v58 = vadd.f32 %v600_v56, %v598_v57 }
 0x127   :  { %602 = vst [vmem:[%s996_s5] sm:$0x1] %v601_v58 }

</bundles_post_ra>
